<compile_context>
chip_gen: v7x
topology: tpu7x:2x2x1
jax: 0.10.0
libtpu: 0.0.40
codegen_flags: <defaults>
</compile_context>

<pallas_src>
import functools
import math

import jax
import jax.numpy as jnp
from jax.experimental import pallas as pl
from jax.experimental.pallas import tpu as pltpu


def _relpos_kernel(*refs, max_rel, t_pad, t_shift, tq, tk):
    """out[q, k_local*U + u] = table[clip(k - q, -R, R) + R, u] for this block."""
    *table_refs, out_ref = refs
    n_cols = tk * t_pad

    qi = pl.program_id(0)
    ki = pl.program_id(1)
    # Single scalar carrying (k_base - q_base + R); iotas supply the rest.
    base = ki * tk - qi * tq + max_rel

    # Per-column constants (depend only on j): k_local = j >> t_shift,
    # t_col = j & (t_pad - 1).  t_pad is a power of two -> pure shift/mask.
    col = jax.lax.broadcasted_iota(jnp.int32, (1, n_cols), 1)
    k_local = jnp.right_shift(col, t_shift)
    t_col = jnp.bitwise_and(col, t_pad - 1)
    row = jax.lax.broadcasted_iota(jnp.int32, (tq, n_cols), 0)

    # idx = clip(k - q, -R, R) + R  ==  clip(k - q + R, 0, 2R)
    idx = jnp.clip((base + k_local) - row, 0, 2 * max_rel)        # (tq, n_cols)
    onehot = (t_col == idx).astype(jnp.bfloat16)                  # exact 0/1

    # (tq, tk*t_pad) @ (tk*t_pad, tk*U) -> (tq, tk*U): lane dense, no reshape.
    acc = jnp.dot(onehot, table_refs[0][...], preferred_element_type=jnp.float32)
    for t_ref in table_refs[1:]:          # lo part of the hi/lo split (f32 out)
        acc = acc + jnp.dot(onehot, t_ref[...], preferred_element_type=jnp.float32)
    out_ref[...] = acc.astype(out_ref.dtype)


def _divisors(n):
    return [d for d in range(1, n + 1) if n % d == 0]


def _pad_table_rows(table_size):
    # Power of two (< 2x waste) so in-kernel div/mod are shift/mask and the
    # contraction dim is nicely aligned for the MXU.
    return max(1, pl.next_power_of_2(table_size))


def _pick_tk(length_k, num_units, table_size, bdiag_cap_bytes):
    """k-tile: output lane width tk*U targeting 512-1024 (256-aligned when
    possible); block-diagonal table capped so it stays small in VMEM."""
    t_pad = _pad_table_rows(table_size)
    cands = []
    for d in _divisors(length_k):
        w = d * num_units
        if w % 128 != 0 and d != length_k:
            continue                      # never emit masked narrow stores
        bdiag_bytes = (d * t_pad) * w * 2  # one bf16 block-diagonal copy
        cands.append((d, w, bdiag_bytes))
    fitting = [c for c in cands if c[2] <= bdiag_cap_bytes]
    pool = fitting if fitting else cands  # awkward shapes: best effort

    def score(c):
        _, w, b = c
        return (not (512 <= w <= 1024 and w % 256 == 0),  # ideal width first
                w % 256 != 0,                             # then 256-aligned
                abs(w - 512),                             # then closest to 512
                b)                                        # then least MXU waste
    return min(pool, key=score)[0]


def _pick_tq(length_q, lane_width, out_itemsize, n_cols, *,
             target_out_bytes, sublane, k_steps):
    """q-tile: VMEM-budgeted output tile; keep >= 2 grid steps for big outputs."""
    cands = [d for d in _divisors(length_q) if d % sublane == 0 or d == length_q]
    row_out = max(1, lane_width * out_itemsize)
    row_tmp = max(1, n_cols * 12)         # int32 idx/dist + bf16 onehot + slack
    lim = max(sublane, min(target_out_bytes // row_out, (4 << 20) // row_tmp))
    fit = [d for d in cands if d <= lim]
    tq = max(fit) if fit else min(cands)
    # v7x has 2 TensorCores: avoid a (1, 1) grid once the output is sizeable.
    if k_steps == 1 and tq == length_q and length_q * row_out > (1 << 20):
        smaller = [d for d in cands if d < length_q]
        if smaller:
            tq = max(smaller)
    return tq


def _vmem_capacity_bytes():
    try:
        cap = getattr(pltpu.get_tpu_info(), "vmem_capacity_bytes", None)
        if cap:
            return int(cap)
    except Exception:
        pass
    return 64 << 20                       # conservative default (v7x physical)


def relative_position(embeddings_table, length_q, length_k,
                      max_relative_position, *, tq=None, tk=None,
                      out_dtype=None):
    """Pallas TPU implementation of RelativePosition.forward.

    embeddings_table: [2*max_rel + 1, num_units].
    Returns [length_q, length_k, num_units] in `out_dtype` (default: the table
    dtype; pass jnp.bfloat16 to halve the HBM writeback of this write-bound op).
    """
    table_size, num_units = embeddings_table.shape
    assert table_size == 2 * max_relative_position + 1
    out_dtype = jnp.dtype(embeddings_table.dtype if out_dtype is None
                          else out_dtype)
    out_itemsize = out_dtype.itemsize

    vmem_cap = _vmem_capacity_bytes()
    big_vmem = vmem_cap >= (96 << 20)     # v5e/v6e: 128 MiB, v7x: 64 MiB

    if tk is None:
        tk = _pick_tk(length_k, num_units, table_size,
                      bdiag_cap_bytes=(4 << 20) if big_vmem else (2 << 20))
    assert length_k % tk == 0
    t_pad = _pad_table_rows(table_size)
    t_shift = int(math.log2(t_pad))
    n_cols = tk * t_pad
    lane_w = tk * num_units

    if tq is None:
        tq = _pick_tq(length_q, lane_w, out_itemsize, n_cols,
                      target_out_bytes=(6 << 20) if big_vmem else (2 << 20),
                      sublane=8 * max(1, 4 // out_itemsize),
                      k_steps=length_k // tk)
    assert length_q % tq == 0

    # Block-diagonal RHS: bdiag[k*t_pad + t, k*U + u] = table[t, u], 0 elsewhere
    # (rows t >= table_size are zero padding and are never selected).
    table_f32 = jnp.zeros((t_pad, num_units), jnp.float32)
    table_f32 = table_f32.at[:table_size].set(embeddings_table.astype(jnp.float32))
    hi = table_f32.astype(jnp.bfloat16)
    eye = jnp.eye(tk, dtype=jnp.bfloat16)
    tables = [jnp.kron(eye, hi)]
    use_lo = (embeddings_table.dtype == jnp.float32) and out_itemsize >= 4
    if use_lo:                            # hi/lo split keeps f32 output ~exact
        lo = (table_f32 - hi.astype(jnp.float32)).astype(jnp.bfloat16)
        tables.append(jnp.kron(eye, lo))

    kernel = functools.partial(_relpos_kernel, max_rel=max_relative_position,
                               t_pad=t_pad, t_shift=t_shift, tq=tq, tk=tk)

    # VMEM budget derived from the actual tiles (not a hard-coded constant).
    out_tile = tq * lane_w * out_itemsize
    bdiag_bytes = sum(t.size * t.dtype.itemsize for t in tables)
    interm = tq * n_cols * 12 + tq * lane_w * 4
    est = 2 * out_tile + 2 * bdiag_bytes + interm
    vmem_limit = int(min(max(2 * est, 32 << 20), int(vmem_cap * 0.9)))

    def _invariant_spec(buffered):
        if buffered and hasattr(pl, "Buffered"):
            try:
                # Grid-invariant input: one VMEM buffer is enough (no double
                # buffering), which matters most within v7x's 64 MiB VMEM.
                return pl.BlockSpec((n_cols, lane_w), lambda qi, ki: (0, 0),
                                    pipeline_mode=pl.Buffered(1))
            except TypeError:
                pass
        return pl.BlockSpec((n_cols, lane_w), lambda qi, ki: (0, 0))

    def _run(buffered):
        return pl.pallas_call(
            kernel,
            out_shape=jax.ShapeDtypeStruct((length_q, length_k * num_units),
                                           out_dtype),
            grid_spec=pltpu.PrefetchScalarGridSpec(
                num_scalar_prefetch=0,
                grid=(length_q // tq, length_k // tk),
                in_specs=[_invariant_spec(buffered) for _ in tables],
                out_specs=pl.BlockSpec((tq, lane_w), lambda qi, ki: (qi, ki)),
            ),
            compiler_params=pltpu.CompilerParams(
                dimension_semantics=("parallel", "parallel"),
                vmem_limit_bytes=vmem_limit),
        )(*tables)

    try:
        out2d = _run(buffered=True)
    except Exception:
        # Fallback for environments where Buffered(1) pipeline_mode is not
        # supported by the top-level TPU pipeliner.
        out2d = _run(buffered=False)

    # Free metadata reshape: (Lq, Lk*U) row-major == (Lq, Lk, U) row-major.
    return out2d.reshape(length_q, length_k, num_units)


def _xavier_uniform(key, shape, dtype=jnp.float32):
    # nn.init.xavier_uniform_ for a 2D tensor: fan_out = shape[0], fan_in = shape[1]
    fan_out, fan_in = shape
    bound = (6.0 / (fan_in + fan_out)) ** 0.5
    return jax.random.uniform(key, shape, dtype, -bound, bound)


def _reference(table, length_q, length_k, max_rel):
    dist = jnp.arange(length_k)[None, :] - jnp.arange(length_q)[:, None]
    return table[jnp.clip(dist, -max_rel, max_rel) + max_rel]


if __name__ == "__main__":
    key = jax.random.PRNGKey(0)
    k1, k2 = jax.random.split(key)

    # Case 1: module-sized example (num_units=32, max_rel=4, Lq=Lk=8).
    U1, R1, LQ1, LK1 = 32, 4, 8, 8
    tab1 = _xavier_uniform(k1, (2 * R1 + 1, U1))
    out1 = jax.block_until_ready(relative_position(tab1, LQ1, LK1, R1))
    ref1 = _reference(tab1, LQ1, LK1, R1)
    assert out1.shape == (LQ1, LK1, U1)
    assert out1.dtype == tab1.dtype
    assert jnp.allclose(out1, ref1, atol=5e-6), "case 1 mismatch vs reference"

    # Case 2: multi-block grid, wide lane-dense tiles, hi/lo exact-f32 path.
    U2, R2, LQ2, LK2 = 32, 8, 256, 64
    tab2 = _xavier_uniform(k2, (2 * R2 + 1, U2))
    out2 = jax.block_until_ready(relative_position(tab2, LQ2, LK2, R2))
    ref2 = _reference(tab2, LQ2, LK2, R2)
    assert out2.shape == (LQ2, LK2, U2)
    assert out2.dtype == tab2.dtype
    assert jnp.allclose(out2, ref2, atol=5e-6), "case 2 mismatch vs reference"

    # Case 3: bf16 output (halves HBM writeback; single hi matmul, bit-exact
    # against the bf16-rounded reference).
    out3 = jax.block_until_ready(
        relative_position(tab2, LQ2, LK2, R2, out_dtype=jnp.bfloat16))
    ref3 = ref2.astype(jnp.bfloat16)
    assert out3.dtype == jnp.bfloat16
    assert out3.shape == (LQ2, LK2, U2)
    assert jnp.array_equal(out3, ref3), "case 3 mismatch vs bf16 reference"

    print("KERNEL_OK")
</pallas_src>

<mosaic_0001>
module attributes {stable_mosaic.version = 11 : i64} {
  func.func @_relpos_kernel(%arg0: i32, %arg1: i32, %arg2: memref<128x256xbf16, #tpu.memory_space<vmem>>, %arg3: memref<128x256xbf16, #tpu.memory_space<vmem>>, %arg4: memref<8x256xf32, #tpu.memory_space<vmem>>) attributes {dimension_semantics = [#tpu.dimension_semantics<parallel>, #tpu.dimension_semantics<parallel>], iteration_bounds = array<i64: 1, 1>, scalar_prefetch = 0 : i64, scratch_operands = 0 : i64, tpu.core_type = #tpu.core_type<tc>, window_params = [{pipeline_mode = #tpu.pipeline_mode<synchronous>, transform_indices = @transform_0, window_bounds = array<i64: 128, 256>}, {pipeline_mode = #tpu.pipeline_mode<synchronous>, transform_indices = @transform_1, window_bounds = array<i64: 128, 256>}, {transform_indices = @transform_2, window_bounds = array<i64: 8, 256>}]} {
    %c8_i32 = arith.constant 8 : i32
    %0 = arith.muli %arg1, %c8_i32 : i32
    %c8_i32_0 = arith.constant 8 : i32
    %1 = arith.muli %arg0, %c8_i32_0 : i32
    %2 = arith.subi %0, %1 : i32
    %c4_i32 = arith.constant 4 : i32
    %3 = arith.addi %2, %c4_i32 : i32
    %4 = tpu.iota {dimensions = array<i32: 1>} : vector<1x128xi32>
    %c4_i32_1 = arith.constant 4 : i32
    %5 = vector.broadcast %c4_i32_1 : i32 to vector<1x128xi32>
    %6 = arith.shrsi %4, %5 : vector<1x128xi32>
    %c15_i32 = arith.constant 15 : i32
    %7 = vector.broadcast %c15_i32 : i32 to vector<1x128xi32>
    %8 = arith.andi %4, %7 : vector<1x128xi32>
    %9 = tpu.iota {dimensions = array<i32: 0>} : vector<8x128xi32>
    %10 = vector.broadcast %3 : i32 to vector<1x128xi32>
    %11 = arith.addi %10, %6 : vector<1x128xi32>
    %12 = vector.broadcast %11 : vector<1x128xi32> to vector<8x128xi32>
    %13 = arith.subi %12, %9 : vector<8x128xi32>
    %c0_i32 = arith.constant 0 : i32
    %c8_i32_2 = arith.constant 8 : i32
    %14 = vector.broadcast %c0_i32 : i32 to vector<8x128xi32>
    %15 = arith.maxsi %14, %13 : vector<8x128xi32>
    %16 = vector.broadcast %c8_i32_2 : i32 to vector<8x128xi32>
    %17 = arith.minsi %16, %15 : vector<8x128xi32>
    %18 = vector.broadcast %8 : vector<1x128xi32> to vector<8x128xi32>
    %19 = arith.cmpi eq, %18, %17 : vector<8x128xi32>
    %20 = arith.extui %19 : vector<8x128xi1> to vector<8x128xi32>
    %21 = arith.sitofp %20 : vector<8x128xi32> to vector<8x128xf32>
    %22 = arith.truncf %21 : vector<8x128xf32> to vector<8x128xbf16>
    %c0 = arith.constant 0 : index
    %c0_3 = arith.constant 0 : index
    %23 = vector.load %arg2[%c0, %c0_3] : memref<128x256xbf16, #tpu.memory_space<vmem>>, vector<128x256xbf16>
    %cst = arith.constant dense<0.000000e+00> : vector<8x256xf32>
    %24 = tpu.matmul %22, %23, %cst {dimension_numbers = #tpu.dot_dimension_numbers<[1], [0], [0], [1], [0, 0, 1, 1], [], []>} : vector<8x128xbf16>, vector<128x256xbf16>, vector<8x256xf32> -> vector<8x256xf32>
    %c0_4 = arith.constant 0 : index
    %c0_5 = arith.constant 0 : index
    %25 = vector.load %arg3[%c0_4, %c0_5] : memref<128x256xbf16, #tpu.memory_space<vmem>>, vector<128x256xbf16>
    %cst_6 = arith.constant dense<0.000000e+00> : vector<8x256xf32>
    %26 = tpu.matmul %22, %25, %cst_6 {dimension_numbers = #tpu.dot_dimension_numbers<[1], [0], [0], [1], [0, 0, 1, 1], [], []>} : vector<8x128xbf16>, vector<128x256xbf16>, vector<8x256xf32> -> vector<8x256xf32>
    %27 = arith.addf %24, %26 : vector<8x256xf32>
    %c0_7 = arith.constant 0 : index
    %c0_8 = arith.constant 0 : index
    %28 = vector.load %arg4[%c0_7, %c0_8] : memref<8x256xf32, #tpu.memory_space<vmem>>, vector<8x256xf32>
    tpu.vector_store %arg4[%c0_7, %c0_8], %27 {strides = array<i32>} : memref<8x256xf32, #tpu.memory_space<vmem>>, vector<8x256xf32>,
    return
  }
  func.func @transform_0(%arg0: i32, %arg1: i32) -> (i32, i32) {
    %c0_i32 = arith.constant 0 : i32
    %c0_i32_0 = arith.constant 0 : i32
    %c0_i32_1 = arith.constant 0 : i32
    return %c0_i32, %c0_i32_0 : i32, i32
  }
  func.func @transform_1(%arg0: i32, %arg1: i32) -> (i32, i32) {
    %c0_i32 = arith.constant 0 : i32
    %c0_i32_0 = arith.constant 0 : i32
    %c0_i32_1 = arith.constant 0 : i32
    return %c0_i32, %c0_i32_0 : i32, i32
  }
  func.func @transform_2(%arg0: i32, %arg1: i32) -> (i32, i32) {
    %c0_i32 = arith.constant 0 : i32
    return %arg0, %arg1 : i32, i32
  }
}

module attributes {stable_mosaic.version = 11 : i64} {
  func.func @_relpos_kernel(%arg0: i32, %arg1: i32, %arg2: memref<128x256xbf16, #tpu.memory_space<vmem>>, %arg3: memref<128x256xbf16, #tpu.memory_space<vmem>>, %arg4: memref<8x256xf32, #tpu.memory_space<vmem>>) attributes {dimension_semantics = [#tpu.dimension_semantics<parallel>, #tpu.dimension_semantics<parallel>], iteration_bounds = array<i64: 1, 1>, scalar_prefetch = 0 : i64, scratch_operands = 0 : i64, tpu.core_type = #tpu.core_type<tc>, window_params = [{pipeline_mode = #tpu.pipeline_mode<synchronous>, transform_indices = @transform_0, window_bounds = array<i64: 128, 256>}, {pipeline_mode = #tpu.pipeline_mode<synchronous>, transform_indices = @transform_1, window_bounds = array<i64: 128, 256>}, {transform_indices = @transform_2, window_bounds = array<i64: 8, 256>}]} {
    %c8_i32 = arith.constant 8 : i32
    %0 = arith.muli %arg1, %c8_i32 : i32
    %c8_i32_0 = arith.constant 8 : i32
    %1 = arith.muli %arg0, %c8_i32_0 : i32
    %2 = arith.subi %0, %1 : i32
    %c4_i32 = arith.constant 4 : i32
    %3 = arith.addi %2, %c4_i32 : i32
    %4 = tpu.iota {dimensions = array<i32: 1>} : vector<1x128xi32>
    %c4_i32_1 = arith.constant 4 : i32
    %5 = vector.broadcast %c4_i32_1 : i32 to vector<1x128xi32>
    %6 = arith.shrsi %4, %5 : vector<1x128xi32>
    %c15_i32 = arith.constant 15 : i32
    %7 = vector.broadcast %c15_i32 : i32 to vector<1x128xi32>
    %8 = arith.andi %4, %7 : vector<1x128xi32>
    %9 = tpu.iota {dimensions = array<i32: 0>} : vector<8x128xi32>
    %10 = vector.broadcast %3 : i32 to vector<1x128xi32>
    %11 = arith.addi %10, %6 : vector<1x128xi32>
    %12 = vector.broadcast %11 : vector<1x128xi32> to vector<8x128xi32>
    %13 = arith.subi %12, %9 : vector<8x128xi32>
    %c0_i32 = arith.constant 0 : i32
    %c8_i32_2 = arith.constant 8 : i32
    %14 = vector.broadcast %c0_i32 : i32 to vector<8x128xi32>
    %15 = arith.maxsi %14, %13 : vector<8x128xi32>
    %16 = vector.broadcast %c8_i32_2 : i32 to vector<8x128xi32>
    %17 = arith.minsi %16, %15 : vector<8x128xi32>
    %18 = vector.broadcast %8 : vector<1x128xi32> to vector<8x128xi32>
    %19 = arith.cmpi eq, %18, %17 : vector<8x128xi32>
    %20 = arith.extui %19 : vector<8x128xi1> to vector<8x128xi32>
    %21 = arith.sitofp %20 : vector<8x128xi32> to vector<8x128xf32>
    %22 = arith.truncf %21 : vector<8x128xf32> to vector<8x128xbf16>
    %c0 = arith.constant 0 : index
    %c0_3 = arith.constant 0 : index
    %23 = vector.load %arg2[%c0, %c0_3] : memref<128x256xbf16, #tpu.memory_space<vmem>>, vector<128x256xbf16>
    %cst = arith.constant dense<0.000000e+00> : vector<8x256xf32>
    %24 = tpu.matmul %22, %23, %cst {dimension_numbers = #tpu.dot_dimension_numbers<[1], [0], [0], [1], [0, 0, 1, 1], [], []>} : vector<8x128xbf16>, vector<128x256xbf16>, vector<8x256xf32> -> vector<8x256xf32>
    %c0_4 = arith.constant 0 : index
    %c0_5 = arith.constant 0 : index
    %25 = vector.load %arg3[%c0_4, %c0_5] : memref<128x256xbf16, #tpu.memory_space<vmem>>, vector<128x256xbf16>
    %cst_6 = arith.constant dense<0.000000e+00> : vector<8x256xf32>
    %26 = tpu.matmul %22, %25, %cst_6 {dimension_numbers = #tpu.dot_dimension_numbers<[1], [0], [0], [1], [0, 0, 1, 1], [], []>} : vector<8x128xbf16>, vector<128x256xbf16>, vector<8x256xf32> -> vector<8x256xf32>
    %27 = arith.addf %24, %26 : vector<8x256xf32>
    %c0_7 = arith.constant 0 : index
    %c0_8 = arith.constant 0 : index
    %28 = vector.load %arg4[%c0_7, %c0_8] : memref<8x256xf32, #tpu.memory_space<vmem>>, vector<8x256xf32>
    tpu.vector_store %arg4[%c0_7, %c0_8], %27 {strides = array<i32>} : memref<8x256xf32, #tpu.memory_space<vmem>>, vector<8x256xf32>,
    return
  }
  func.func @transform_0(%arg0: i32, %arg1: i32) -> (i32, i32) {
    %c0_i32 = arith.constant 0 : i32
    %c0_i32_0 = arith.constant 0 : i32
    %c0_i32_1 = arith.constant 0 : i32
    return %c0_i32, %c0_i32_0 : i32, i32
  }
  func.func @transform_1(%arg0: i32, %arg1: i32) -> (i32, i32) {
    %c0_i32 = arith.constant 0 : i32
    %c0_i32_0 = arith.constant 0 : i32
    %c0_i32_1 = arith.constant 0 : i32
    return %c0_i32, %c0_i32_0 : i32, i32
  }
  func.func @transform_2(%arg0: i32, %arg1: i32) -> (i32, i32) {
    %c0_i32 = arith.constant 0 : i32
    return %arg0, %arg1 : i32, i32
  }
}

</mosaic_0001>

<bundles_post_ra>
// kernel: tpu_custom_call.1
= control target key start
LH: loop header
LB: loop body
LE: loop exit
PB: predicated region body
PF: predicated region fallthrough
CT: control target
= control target key end

     0   :  { %7 = vsyncpa [#allocation3], 0  ;;  %s582_s0 = inlined_call_operand.hbm [shape: bf16[128,256], index: 0, kind: input, shape index: {}]   ;;  %s583_s1 = inlined_call_operand.hbm [shape: bf16[128,256], index: 1, kind: input, shape index: {}]   ;;  %s584_s2 = inlined_call_operand.hbm [shape: f32[8,256], index: 2, kind: output, shape index: {}]  }
   0x1   :  { %8 = vsyncpa [#allocation6], 0 }
   0x2   :  { %9 = vsyncpa [#allocation4], 0  ;;  %s520_s9 = smov [#allocation2]   ;;  %s448_s13 = scalar_lea.hbm %s582_s0, 2048 }
   0x3   :  { %s15_s10 = sshll.u32 %s520_s9, 4  ;;  %p449_p0 = scmp.ne.s32.totalorder %s582_s0, %s448_s13  ;;  %s16_s10 = int_to_ptr.vmem [resolvable:$true] %s15_s10 }
   0x4   :  { %p452_p1 = scmp.lt.u32.totalorder %s448_s13, %s582_s0 }
   0x6   :  { %p454_p2 = pnand %p452_p1, %p449_p0 }
   0x8   :  { %457 = shalt.err (!%p454_p2)
}
   0x9   :  { %s458_s18 = scalar_lea.vmem %s16_s10, 2048  ;;  %p463_p4 = scmp.lt.s32.totalorder %s16_s10, %s16_s10 }
   0xa   :  { %p459_p3 = scmp.ne.s32.totalorder %s16_s10, %s458_s18  ;;  %p464_p5 = scmp.lt.s32.totalorder %s458_s18, %s458_s18 }
   0xc   :  { %p465_p6 = por %p464_p5, %p463_p4 }
   0xe   :  { %p466_p7 = pnand %p465_p6, %p459_p3 }
  0x10   :  { %469 = shalt.err (!%p466_p7)
}
  0x11   :  { %s521_s19 = smov 128   ;;  %s522_s20 = smov 8  }
  0x12   :  { %21 = dma.hbm_to_vmem [thread:$0]  %s582_s0, 2048, %s16_s10, [#allocation3], %s521_s19, %s521_s19, %s522_s20  }
  0x13   :  { %s523_s23 = smov [#allocation5]   ;;  %s470_s27 = scalar_lea.hbm %s583_s1, 2048 }
  0x14   :  { %s27_s24 = sshll.u32 %s523_s23, 4  ;;  %p471_p8 = scmp.ne.s32.totalorder %s583_s1, %s470_s27  ;;  %s28_s24 = int_to_ptr.vmem [resolvable:$true] %s27_s24 }
  0x15   :  { %p474_p9 = scmp.lt.u32.totalorder %s470_s27, %s583_s1 }
  0x17   :  { %p476_p10 = pnand %p474_p9, %p471_p8 }
  0x19   :  { %479 = shalt.err (!%p476_p10)
}
  0x1a   :  { %s480_s4 = scalar_lea.vmem %s28_s24, 2048  ;;  %p485_p12 = scmp.lt.s32.totalorder %s28_s24, %s28_s24 }
  0x1b   :  { %p481_p11 = scmp.ne.s32.totalorder %s28_s24, %s480_s4  ;;  %p486_p13 = scmp.lt.s32.totalorder %s480_s4, %s480_s4 }
  0x1d   :  { %p487_p0 = por %p486_p13, %p485_p12 }
  0x1f   :  { %p488_p1 = pnand %p487_p0, %p481_p11 }
  0x21   :  { %491 = shalt.err (!%p488_p1)
}
  0x22   :  { %33 = dma.hbm_to_vmem [thread:$0]  %s583_s1, 2048, %s28_s24, [#allocation6], %s521_s19, %s521_s19, %s522_s20  }
  0x23   :  { %514 = dma.done.wait [#allocation3], 2048  }
  0x24   :  { %515 = vsyncadd [#allocation3], 4294965248 }
  0x25   :  { %516 = dma.done.wait [#allocation6], 2048  }
  0x26   :  { %517 = vsyncadd [#allocation6], 4294965248  ;;  %v524_v0 = vmov 0   ;;  %v45_v1 = vlaneseq  ;;  %v400_v2 = vld [vmem:[#allocation5 + $0x4] ss:$8 sps:$4 sm:$0xff]   ;;  %s526_s1 = smov [#allocation7]  }
  0x27   :  { %206 = vmatprep.mubr.bf16.mxu1 %v524_v0  ;;  %327 = vmatprep.mubr.bf16.mxu0 %v524_v0  ;;  %v402_v3 = vld [vmem:[#allocation2 + $0x4] ss:$8 sps:$4 sm:$0xff]   ;;  %v404_v5 = vld [vmem:[#allocation5] ss:$8 sps:$4 sm:$0xff]   ;;  %v406_v7 = vld [vmem:[#allocation5 + $0x14] ss:$8 sps:$4 sm:$0xff]  }
  0x28   :  { %v566_v4 = vand.u32 127, %v45_v1  ;;  %174 = vmatprep.subr.bf16.mxu1 %v400_v2  ;;  %v405_v6 = vld [vmem:[#allocation2] ss:$8 sps:$4 sm:$0xff]   ;;  %295 = vmatprep.subr.bf16.mxu0 %v402_v3  ;;  %v408_v8 = vld [vmem:[#allocation2 + $0x14] ss:$8 sps:$4 sm:$0xff]   ;;  %v50_v18 = vshrl.u32 %v45_v1, 7 }
  0x29   :  { %175 = vmatpush1.bf16.msra.mxu1 %v404_v5  ;;  %296 = vmatpush1.bf16.msra.mxu0 %v405_v6  ;;  %v410_v9 = vld [vmem:[#allocation5 + $0x10] ss:$8 sps:$4 sm:$0xff]   ;;  %v412_v12 = vld [vmem:[#allocation5 + $0x24] ss:$8 sps:$4 sm:$0xff]   ;;  %v416_v14 = vld [vmem:[#allocation5 + $0x20] ss:$8 sps:$4 sm:$0xff]  }
  0x2a   :  { %176 = vmatprep.subr.bf16.mxu1 %v406_v7  ;;  %v411_v10 = vld [vmem:[#allocation2 + $0x10] ss:$8 sps:$4 sm:$0xff]   ;;  %v47_v11 = vshra.s32 %v566_v4, 4  ;;  %297 = vmatprep.subr.bf16.mxu0 %v408_v8  ;;  %v414_v13 = vld [vmem:[#allocation2 + $0x24] ss:$8 sps:$4 sm:$0xff]   ;;  %v48_v38 = vand.u32 15, %v566_v4 }
  0x2b   :  { %v417_v15 = vld [vmem:[#allocation2 + $0x20] ss:$8 sps:$4 sm:$0xff]   ;;  %v418_v16 = vld [vmem:[#allocation5 + $0x34] ss:$8 sps:$4 sm:$0xff]   ;;  %v422_v20 = vld [vmem:[#allocation5 + $0x30] ss:$8 sps:$4 sm:$0xff]  }
  0x2c   :  { %v420_v17 = vld [vmem:[#allocation2 + $0x34] ss:$8 sps:$4 sm:$0xff]   ;;  %v52_v19 = vadd.s32 4, %v47_v11  ;;  %v423_v21 = vld [vmem:[#allocation2 + $0x30] ss:$8 sps:$4 sm:$0xff]   ;;  %s344_s6 = sshll.u32 %s526_s1, 4  ;;  %s345_s6 = int_to_ptr.vmem [resolvable:$true] %s344_s6 }
  0x2d   :  { %177 = vmatpush1.bf16.msra.mxu1 %v410_v9  ;;  %298 = vmatpush1.bf16.msra.mxu0 %v411_v10  ;;  %v424_v22 = vld [vmem:[#allocation5 + $0x44] ss:$8 sps:$4 sm:$0xff]   ;;  %v428_v25 = vld [vmem:[#allocation5 + $0x40] ss:$8 sps:$4 sm:$0xff]   ;;  %v430_v27 = vld [vmem:[#allocation5 + $0x54] ss:$8 sps:$4 sm:$0xff]   ;;  %p497_p3 = scmp.lt.s32.totalorder %s345_s6, %s345_s6 }
  0x2e   :  { %178 = vmatprep.subr.bf16.mxu1 %v412_v12  ;;  %299 = vmatprep.subr.bf16.mxu0 %v414_v13  ;;  %v426_v23 = vld [vmem:[#allocation2 + $0x44] ss:$8 sps:$4 sm:$0xff]   ;;  %v53_v24 = vsub.s32 %v52_v19, %v50_v18  ;;  %v429_v26 = vld [vmem:[#allocation2 + $0x40] ss:$8 sps:$4 sm:$0xff]   ;;  %v432_v28 = vld [vmem:[#allocation2 + $0x54] ss:$8 sps:$4 sm:$0xff]  }
  0x2f   :  { %v434_v29 = vld [vmem:[#allocation5 + $0x50] ss:$8 sps:$4 sm:$0xff]   ;;  %v436_v32 = vld [vmem:[#allocation5 + $0x64] ss:$8 sps:$4 sm:$0xff]   ;;  %v440_v34 = vld [vmem:[#allocation5 + $0x60] ss:$8 sps:$4 sm:$0xff]  }
  0x30   :  { %vm54_vm0 = vcmp.gt.s32.totalorder %v53_v24, 0  ;;  %v435_v30 = vld [vmem:[#allocation2 + $0x50] ss:$8 sps:$4 sm:$0xff]   ;;  %v438_v33 = vld [vmem:[#allocation2 + $0x64] ss:$8 sps:$4 sm:$0xff]   ;;  %s492_s7 = scalar_lea.vmem %s345_s6, 256 }
  0x31   :  { %179 = vmatpush1.bf16.msra.mxu1 %v416_v14  ;;  %300 = vmatpush1.bf16.msra.mxu0 %v417_v15  ;;  %v55_v31 = vsel %vm54_vm0, %v53_v24, 0  ;;  %v441_v35 = vld [vmem:[#allocation2 + $0x60] ss:$8 sps:$4 sm:$0xff]   ;;  %v442_v36 = vld [vmem:[#allocation5 + $0x74] ss:$8 sps:$4 sm:$0xff]   ;;  %p493_p2 = scmp.ne.s32.totalorder %s345_s6, %s492_s7  ;;  %p498_p4 = scmp.lt.s32.totalorder %s492_s7, %s492_s7 }
  0x32   :  { %180 = vmatprep.subr.bf16.mxu1 %v418_v16  ;;  %301 = vmatprep.subr.bf16.mxu0 %v420_v17  ;;  %vm56_vm1 = vcmp.lt.s32.totalorder %v55_v31, 8  ;;  %v444_v37 = vld [vmem:[#allocation2 + $0x74] ss:$8 sps:$4 sm:$0xff]   ;;  %v446_v40 = vld [vmem:[#allocation5 + $0x70] ss:$8 sps:$4 sm:$0xff]  }
  0x33   :  { %v57_v39 = vsel %vm56_vm1, %v55_v31, 8  ;;  %v447_v41 = vld [vmem:[#allocation2 + $0x70] ss:$8 sps:$4 sm:$0xff]   ;;  %v525_v42 = vmov 1.0|1.0   ;;  %p499_p5 = por %p498_p4, %p497_p3 }
  0x34   :  { %vm58_vm2 = vcmp.eq.s32.totalorder %v48_v38, %v57_v39 }
  0x35   :  { %181 = vmatpush1.bf16.msra.mxu1 %v422_v20  ;;  %302 = vmatpush1.bf16.msra.mxu0 %v423_v21  ;;  %vm371_vm3 = vmpackc.low %vm58_vm2, %vm58_vm2  ;;  %p500_p6 = pnand %p499_p5, %p493_p2 }
  0x36   :  { %182 = vmatprep.subr.bf16.mxu1 %v424_v22  ;;  %303 = vmatprep.subr.bf16.mxu0 %v426_v23 }
  0x39   :  { %183 = vmatpush1.bf16.msra.mxu1 %v428_v25  ;;  %304 = vmatpush1.bf16.msra.mxu0 %v429_v26 }
  0x3a   :  { %184 = vmatprep.subr.bf16.mxu1 %v430_v27  ;;  %305 = vmatprep.subr.bf16.mxu0 %v432_v28 }
  0x3d   :  { %185 = vmatpush1.bf16.msra.mxu1 %v434_v29  ;;  %306 = vmatpush1.bf16.msra.mxu0 %v435_v30 }
  0x3e   :  { %186 = vmatprep.subr.bf16.mxu1 %v436_v32  ;;  %307 = vmatprep.subr.bf16.mxu0 %v438_v33 }
  0x41   :  { %187 = vmatpush1.bf16.msra.mxu1 %v440_v34  ;;  %308 = vmatpush1.bf16.msra.mxu0 %v441_v35 }
  0x42   :  { %188 = vmatprep.subr.bf16.mxu1 %v442_v36  ;;  %309 = vmatprep.subr.bf16.mxu0 %v444_v37 }
  0x45   :  { %189 = vmatpush1.bf16.msra.mxu1 %v446_v40  ;;  %310 = vmatpush1.bf16.msra.mxu0 %v447_v41 }
  0x48   :  { %372 = vmatmul.mubr.msk.bf16.vlgmr.msra.gmra.mrb[0].mxu1 %vm371_vm3, %v525_v42  ;;  %390 = vmatmul.mubr.msk.bf16.vlgmr.msra.gmra.mrb[0].mxu0 %vm371_vm3, %v525_v42 }
 0x11b   :  { %v208_v43 = vpop.f32.mrb[0].mxu1  ;;  %v329_v44 = vpop.f32.mrb[0].mxu0 }
 0x11c   :  { %v330_v45 = vadd.f32 %v329_v44, %v208_v43  ;;  %v210_v46 = vpop.f32.mrb[1].mxu1  ;;  %v331_v47 = vpop.f32.mrb[1].mxu0 }
 0x11d   :  { %v332_v48 = vadd.f32 %v331_v47, %v210_v46  ;;  %v212_v49 = vpop.f32.mrb[2].mxu1  ;;  %v333_v50 = vpop.f32.mrb[2].mxu0 }
 0x11e   :  { %336 = vst [vmem:[#allocation7] sm:$0xff] %v330_v45  ;;  %v213_v51 = vpop.f32.mrb[3].mxu1  ;;  %v334_v52 = vpop.f32.mrb[3].mxu0 }
 0x11f   :  { %337 = vst [vmem:[#allocation7 + $0x8] sm:$0xff] %v332_v48 }
 0x120   :  { %503 = shalt.err (!%p500_p6)
}
 0x121   :  { %s504_s10 = scalar_lea.hbm %s584_s2, 256 }
 0x122   :  { %p505_p7 = scmp.ne.s32.totalorder %s584_s2, %s504_s10  ;;  %p508_p8 = scmp.lt.u32.totalorder %s504_s10, %s584_s2 }
 0x124   :  { %p510_p9 = pnand %p508_p8, %p505_p7 }
 0x126   :  { %513 = shalt.err (!%p510_p9)
}
 0x127   :  { %347 = dma.vmem_to_hbm [thread:$0]  %s345_s6, 256, %s584_s2, [#allocation4]  }
 0x128   :  { %518 = dma.done.wait [#allocation4], 256  }
 0x129   :  { %519 = vsyncadd [#allocation4], 4294967040 }
 0x12a   :  { %351 = vsyncpa [#allocation3], 1 }
 0x12b   :  { %352 = vsyncpa [#allocation6], 1 }
 0x12c   :  { %353 = vsyncpa [#allocation4], 1 }

// kernel: tpu_custom_call.1
= control target key start
LH: loop header
LB: loop body
LE: loop exit
PB: predicated region body
PF: predicated region fallthrough
CT: control target
= control target key end

     0   :  { %7 = vsyncpa [#allocation3], 0  ;;  %s582_s0 = inlined_call_operand.hbm [shape: bf16[128,256], index: 0, kind: input, shape index: {}]   ;;  %s583_s1 = inlined_call_operand.hbm [shape: bf16[128,256], index: 1, kind: input, shape index: {}]   ;;  %s584_s2 = inlined_call_operand.hbm [shape: f32[8,256], index: 2, kind: output, shape index: {}]  }
   0x1   :  { %8 = vsyncpa [#allocation6], 0 }
   0x2   :  { %9 = vsyncpa [#allocation4], 0  ;;  %s520_s9 = smov [#allocation2]   ;;  %s448_s13 = scalar_lea.hbm %s582_s0, 2048 }
   0x3   :  { %s15_s10 = sshll.u32 %s520_s9, 4  ;;  %p449_p0 = scmp.ne.s32.totalorder %s582_s0, %s448_s13  ;;  %s16_s10 = int_to_ptr.vmem [resolvable:$true] %s15_s10 }
   0x4   :  { %p452_p1 = scmp.lt.u32.totalorder %s448_s13, %s582_s0 }
   0x6   :  { %p454_p2 = pnand %p452_p1, %p449_p0 }
   0x8   :  { %457 = shalt.err (!%p454_p2)
}
   0x9   :  { %s458_s18 = scalar_lea.vmem %s16_s10, 2048  ;;  %p463_p4 = scmp.lt.s32.totalorder %s16_s10, %s16_s10 }
   0xa   :  { %p459_p3 = scmp.ne.s32.totalorder %s16_s10, %s458_s18  ;;  %p464_p5 = scmp.lt.s32.totalorder %s458_s18, %s458_s18 }
   0xc   :  { %p465_p6 = por %p464_p5, %p463_p4 }
   0xe   :  { %p466_p7 = pnand %p465_p6, %p459_p3 }
  0x10   :  { %469 = shalt.err (!%p466_p7)
}
  0x11   :  { %s521_s19 = smov 128   ;;  %s522_s20 = smov 8  }
  0x12   :  { %21 = dma.hbm_to_vmem [thread:$0]  %s582_s0, 2048, %s16_s10, [#allocation3], %s521_s19, %s521_s19, %s522_s20  }
  0x13   :  { %s523_s23 = smov [#allocation5]   ;;  %s470_s27 = scalar_lea.hbm %s583_s1, 2048 }
  0x14   :  { %s27_s24 = sshll.u32 %s523_s23, 4  ;;  %p471_p8 = scmp.ne.s32.totalorder %s583_s1, %s470_s27  ;;  %s28_s24 = int_to_ptr.vmem [resolvable:$true] %s27_s24 }
  0x15   :  { %p474_p9 = scmp.lt.u32.totalorder %s470_s27, %s583_s1 }
  0x17   :  { %p476_p10 = pnand %p474_p9, %p471_p8 }
  0x19   :  { %479 = shalt.err (!%p476_p10)
}
  0x1a   :  { %s480_s4 = scalar_lea.vmem %s28_s24, 2048  ;;  %p485_p12 = scmp.lt.s32.totalorder %s28_s24, %s28_s24 }
  0x1b   :  { %p481_p11 = scmp.ne.s32.totalorder %s28_s24, %s480_s4  ;;  %p486_p13 = scmp.lt.s32.totalorder %s480_s4, %s480_s4 }
  0x1d   :  { %p487_p0 = por %p486_p13, %p485_p12 }
  0x1f   :  { %p488_p1 = pnand %p487_p0, %p481_p11 }
  0x21   :  { %491 = shalt.err (!%p488_p1)
}
  0x22   :  { %33 = dma.hbm_to_vmem [thread:$0]  %s583_s1, 2048, %s28_s24, [#allocation6], %s521_s19, %s521_s19, %s522_s20  }
  0x23   :  { %514 = dma.done.wait [#allocation3], 2048  }
  0x24   :  { %515 = vsyncadd [#allocation3], 4294965248 }
  0x25   :  { %516 = dma.done.wait [#allocation6], 2048  }
  0x26   :  { %517 = vsyncadd [#allocation6], 4294965248  ;;  %v524_v0 = vmov 0   ;;  %v45_v1 = vlaneseq  ;;  %v400_v2 = vld [vmem:[#allocation5 + $0x4] ss:$8 sps:$4 sm:$0xff]   ;;  %s526_s1 = smov [#allocation7]  }
  0x27   :  { %206 = vmatprep.mubr.bf16.mxu1 %v524_v0  ;;  %327 = vmatprep.mubr.bf16.mxu0 %v524_v0  ;;  %v402_v3 = vld [vmem:[#allocation2 + $0x4] ss:$8 sps:$4 sm:$0xff]   ;;  %v404_v5 = vld [vmem:[#allocation5] ss:$8 sps:$4 sm:$0xff]   ;;  %v406_v7 = vld [vmem:[#allocation5 + $0x14] ss:$8 sps:$4 sm:$0xff]  }
  0x28   :  { %v566_v4 = vand.u32 127, %v45_v1  ;;  %174 = vmatprep.subr.bf16.mxu1 %v400_v2  ;;  %v405_v6 = vld [vmem:[#allocation2] ss:$8 sps:$4 sm:$0xff]   ;;  %295 = vmatprep.subr.bf16.mxu0 %v402_v3  ;;  %v408_v8 = vld [vmem:[#allocation2 + $0x14] ss:$8 sps:$4 sm:$0xff]   ;;  %v50_v18 = vshrl.u32 %v45_v1, 7 }
  0x29   :  { %175 = vmatpush1.bf16.msra.mxu1 %v404_v5  ;;  %296 = vmatpush1.bf16.msra.mxu0 %v405_v6  ;;  %v410_v9 = vld [vmem:[#allocation5 + $0x10] ss:$8 sps:$4 sm:$0xff]   ;;  %v412_v12 = vld [vmem:[#allocation5 + $0x24] ss:$8 sps:$4 sm:$0xff]   ;;  %v416_v14 = vld [vmem:[#allocation5 + $0x20] ss:$8 sps:$4 sm:$0xff]  }
  0x2a   :  { %176 = vmatprep.subr.bf16.mxu1 %v406_v7  ;;  %v411_v10 = vld [vmem:[#allocation2 + $0x10] ss:$8 sps:$4 sm:$0xff]   ;;  %v47_v11 = vshra.s32 %v566_v4, 4  ;;  %297 = vmatprep.subr.bf16.mxu0 %v408_v8  ;;  %v414_v13 = vld [vmem:[#allocation2 + $0x24] ss:$8 sps:$4 sm:$0xff]   ;;  %v48_v38 = vand.u32 15, %v566_v4 }
  0x2b   :  { %v417_v15 = vld [vmem:[#allocation2 + $0x20] ss:$8 sps:$4 sm:$0xff]   ;;  %v418_v16 = vld [vmem:[#allocation5 + $0x34] ss:$8 sps:$4 sm:$0xff]   ;;  %v422_v20 = vld [vmem:[#allocation5 + $0x30] ss:$8 sps:$4 sm:$0xff]  }
  0x2c   :  { %v420_v17 = vld [vmem:[#allocation2 + $0x34] ss:$8 sps:$4 sm:$0xff]   ;;  %v52_v19 = vadd.s32 4, %v47_v11  ;;  %v423_v21 = vld [vmem:[#allocation2 + $0x30] ss:$8 sps:$4 sm:$0xff]   ;;  %s344_s6 = sshll.u32 %s526_s1, 4  ;;  %s345_s6 = int_to_ptr.vmem [resolvable:$true] %s344_s6 }
  0x2d   :  { %177 = vmatpush1.bf16.msra.mxu1 %v410_v9  ;;  %298 = vmatpush1.bf16.msra.mxu0 %v411_v10  ;;  %v424_v22 = vld [vmem:[#allocation5 + $0x44] ss:$8 sps:$4 sm:$0xff]   ;;  %v428_v25 = vld [vmem:[#allocation5 + $0x40] ss:$8 sps:$4 sm:$0xff]   ;;  %v430_v27 = vld [vmem:[#allocation5 + $0x54] ss:$8 sps:$4 sm:$0xff]   ;;  %p497_p3 = scmp.lt.s32.totalorder %s345_s6, %s345_s6 }
  0x2e   :  { %178 = vmatprep.subr.bf16.mxu1 %v412_v12  ;;  %299 = vmatprep.subr.bf16.mxu0 %v414_v13  ;;  %v426_v23 = vld [vmem:[#allocation2 + $0x44] ss:$8 sps:$4 sm:$0xff]   ;;  %v53_v24 = vsub.s32 %v52_v19, %v50_v18  ;;  %v429_v26 = vld [vmem:[#allocation2 + $0x40] ss:$8 sps:$4 sm:$0xff]   ;;  %v432_v28 = vld [vmem:[#allocation2 + $0x54] ss:$8 sps:$4 sm:$0xff]  }
  0x2f   :  { %v434_v29 = vld [vmem:[#allocation5 + $0x50] ss:$8 sps:$4 sm:$0xff]   ;;  %v436_v32 = vld [vmem:[#allocation5 + $0x64] ss:$8 sps:$4 sm:$0xff]   ;;  %v440_v34 = vld [vmem:[#allocation5 + $0x60] ss:$8 sps:$4 sm:$0xff]  }
  0x30   :  { %vm54_vm0 = vcmp.gt.s32.totalorder %v53_v24, 0  ;;  %v435_v30 = vld [vmem:[#allocation2 + $0x50] ss:$8 sps:$4 sm:$0xff]   ;;  %v438_v33 = vld [vmem:[#allocation2 + $0x64] ss:$8 sps:$4 sm:$0xff]   ;;  %s492_s7 = scalar_lea.vmem %s345_s6, 256 }
  0x31   :  { %179 = vmatpush1.bf16.msra.mxu1 %v416_v14  ;;  %300 = vmatpush1.bf16.msra.mxu0 %v417_v15  ;;  %v55_v31 = vsel %vm54_vm0, %v53_v24, 0  ;;  %v441_v35 = vld [vmem:[#allocation2 + $0x60] ss:$8 sps:$4 sm:$0xff]   ;;  %v442_v36 = vld [vmem:[#allocation5 + $0x74] ss:$8 sps:$4 sm:$0xff]   ;;  %p493_p2 = scmp.ne.s32.totalorder %s345_s6, %s492_s7  ;;  %p498_p4 = scmp.lt.s32.totalorder %s492_s7, %s492_s7 }
  0x32   :  { %180 = vmatprep.subr.bf16.mxu1 %v418_v16  ;;  %301 = vmatprep.subr.bf16.mxu0 %v420_v17  ;;  %vm56_vm1 = vcmp.lt.s32.totalorder %v55_v31, 8  ;;  %v444_v37 = vld [vmem:[#allocation2 + $0x74] ss:$8 sps:$4 sm:$0xff]   ;;  %v446_v40 = vld [vmem:[#allocation5 + $0x70] ss:$8 sps:$4 sm:$0xff]  }
  0x33   :  { %v57_v39 = vsel %vm56_vm1, %v55_v31, 8  ;;  %v447_v41 = vld [vmem:[#allocation2 + $0x70] ss:$8 sps:$4 sm:$0xff]   ;;  %v525_v42 = vmov 1.0|1.0   ;;  %p499_p5 = por %p498_p4, %p497_p3 }
  0x34   :  { %vm58_vm2 = vcmp.eq.s32.totalorder %v48_v38, %v57_v39 }
  0x35   :  { %181 = vmatpush1.bf16.msra.mxu1 %v422_v20  ;;  %302 = vmatpush1.bf16.msra.mxu0 %v423_v21  ;;  %vm371_vm3 = vmpackc.low %vm58_vm2, %vm58_vm2  ;;  %p500_p6 = pnand %p499_p5, %p493_p2 }
  0x36   :  { %182 = vmatprep.subr.bf16.mxu1 %v424_v22  ;;  %303 = vmatprep.subr.bf16.mxu0 %v426_v23 }
  0x39   :  { %183 = vmatpush1.bf16.msra.mxu1 %v428_v25  ;;  %304 = vmatpush1.bf16.msra.mxu0 %v429_v26 }
  0x3a   :  { %184 = vmatprep.subr.bf16.mxu1 %v430_v27  ;;  %305 = vmatprep.subr.bf16.mxu0 %v432_v28 }
  0x3d   :  { %185 = vmatpush1.bf16.msra.mxu1 %v434_v29  ;;  %306 = vmatpush1.bf16.msra.mxu0 %v435_v30 }
  0x3e   :  { %186 = vmatprep.subr.bf16.mxu1 %v436_v32  ;;  %307 = vmatprep.subr.bf16.mxu0 %v438_v33 }
  0x41   :  { %187 = vmatpush1.bf16.msra.mxu1 %v440_v34  ;;  %308 = vmatpush1.bf16.msra.mxu0 %v441_v35 }
  0x42   :  { %188 = vmatprep.subr.bf16.mxu1 %v442_v36  ;;  %309 = vmatprep.subr.bf16.mxu0 %v444_v37 }
  0x45   :  { %189 = vmatpush1.bf16.msra.mxu1 %v446_v40  ;;  %310 = vmatpush1.bf16.msra.mxu0 %v447_v41 }
  0x48   :  { %372 = vmatmul.mubr.msk.bf16.vlgmr.msra.gmra.mrb[0].mxu1 %vm371_vm3, %v525_v42  ;;  %390 = vmatmul.mubr.msk.bf16.vlgmr.msra.gmra.mrb[0].mxu0 %vm371_vm3, %v525_v42 }
 0x11b   :  { %v208_v43 = vpop.f32.mrb[0].mxu1  ;;  %v329_v44 = vpop.f32.mrb[0].mxu0 }
 0x11c   :  { %v330_v45 = vadd.f32 %v329_v44, %v208_v43  ;;  %v210_v46 = vpop.f32.mrb[1].mxu1  ;;  %v331_v47 = vpop.f32.mrb[1].mxu0 }
 0x11d   :  { %v332_v48 = vadd.f32 %v331_v47, %v210_v46  ;;  %v212_v49 = vpop.f32.mrb[2].mxu1  ;;  %v333_v50 = vpop.f32.mrb[2].mxu0 }
 0x11e   :  { %336 = vst [vmem:[#allocation7] sm:$0xff] %v330_v45  ;;  %v213_v51 = vpop.f32.mrb[3].mxu1  ;;  %v334_v52 = vpop.f32.mrb[3].mxu0 }
 0x11f   :  { %337 = vst [vmem:[#allocation7 + $0x8] sm:$0xff] %v332_v48 }
 0x120   :  { %503 = shalt.err (!%p500_p6)
}
 0x121   :  { %s504_s10 = scalar_lea.hbm %s584_s2, 256 }
 0x122   :  { %p505_p7 = scmp.ne.s32.totalorder %s584_s2, %s504_s10  ;;  %p508_p8 = scmp.lt.u32.totalorder %s504_s10, %s584_s2 }
 0x124   :  { %p510_p9 = pnand %p508_p8, %p505_p7 }
 0x126   :  { %513 = shalt.err (!%p510_p9)
}
 0x127   :  { %347 = dma.vmem_to_hbm [thread:$0]  %s345_s6, 256, %s584_s2, [#allocation4]  }
 0x128   :  { %518 = dma.done.wait [#allocation4], 256  }
 0x129   :  { %519 = vsyncadd [#allocation4], 4294967040 }
 0x12a   :  { %351 = vsyncpa [#allocation3], 1 }
 0x12b   :  { %352 = vsyncpa [#allocation6], 1 }
 0x12c   :  { %353 = vsyncpa [#allocation4], 1 }

</bundles_post_ra>
